<compile_context>
chip_gen: v5e
topology: v5e:2x2
jax: 0.10.0
libtpu: 0.0.40
codegen_flags: <defaults>
</compile_context>

<pallas_src>
import jax
import jax.numpy as jnp
import numpy as np
from jax.experimental import pallas as pl
from jax.experimental.pallas import tpu as pltpu


def _round_up(n, m):
    return ((n + m - 1) // m) * m


def _cdiv(a, b):
    return -(-a // b)


_VMEM_TILE_BUDGET = 16 * 1024 * 1024   # bytes used when sizing TB
_VMEM_LIMIT_BYTES = 32 * 1024 * 1024   # scoped VMEM request (safe on all gens)


# ---------------------------------------------------------------------------
# Kernels.  Activations are batch-on-LANES: each tile is (K, TB) with K on
# sublanes, so loads are lane-dense and each per-pair result is a single
# unmasked lane-dense (1, TB) row store.  Weights are tiny and resident.
# ---------------------------------------------------------------------------

def _ncf_infer_kernel(u_ref, v_ref, w1u_ref, w1v_ref, b1_ref, w2_ref, out_ref):
    # linear_1 on concat([U, V]) == W1[:, :K] @ U^T + W1[:, K:] @ V^T
    su = jnp.dot(w1u_ref[...], u_ref[...], preferred_element_type=jnp.float32)
    sv = jnp.dot(w1v_ref[...], v_ref[...], preferred_element_type=jnp.float32)
    h1 = jnp.maximum(su + sv + b1_ref[...], 0.0)                  # (K, TB)
    # linear_2 (no bias): scale + sublane (XLU) reduce -> lane-dense (1, TB).
    out_ref[...] = jnp.sum(w2_ref[...] * h1, axis=0, keepdims=True)


def _ncf_train_kernel(u_ref, v_ref, ur_ref, vr_ref,
                      w1u_ref, w1v_ref, b1_ref, w2_ref,
                      out_ref, out_r_ref, out_all_ref):
    w1u = w1u_ref[...]
    w1v = w1v_ref[...]
    b1 = b1_ref[...]
    w2 = w2_ref[...]
    su = jnp.dot(w1u, u_ref[...], preferred_element_type=jnp.float32)
    sv = jnp.dot(w1v, v_ref[...], preferred_element_type=jnp.float32)
    sur = jnp.dot(w1u, ur_ref[...], preferred_element_type=jnp.float32)
    svr = jnp.dot(w1v, vr_ref[...], preferred_element_type=jnp.float32)
    pre = su + sv                       # W1 @ [U; V]
    pre_r = sur + svr                   # W1 @ [U_r; V_r]
    pre_all = pre + pre_r               # == W1 @ [U+U_r; V+V_r]
    out_ref[...] = jnp.sum(w2 * jnp.maximum(pre + b1, 0.0),
                           axis=0, keepdims=True)
    out_r_ref[...] = jnp.sum(w2 * jnp.maximum(pre_r + b1, 0.0),
                             axis=0, keepdims=True)
    out_all_ref[...] = jnp.sum(w2 * jnp.maximum(pre_all + b1, 0.0),
                               axis=0, keepdims=True)


# ---------------------------------------------------------------------------
# Tile sizing + pallas_call wrappers.
# ---------------------------------------------------------------------------

def _pick_tile(b, k, n_act, n_out):
    """Largest lane-tile TB that fits the VMEM budget, with >=2 grid steps
    whenever there is enough batch (v7x megacore), multiple of 128."""
    kp = _round_up(max(k, 1), 8)        # sublane padding of (K, TB) tiles
    per_lane = (2 * n_act * kp * 4      # double-buffered activation tiles
                + 8 * kp * 4            # f32 (Kp, TB) temporaries (estimate)
                + 2 * n_out * 8 * 4)    # double-buffered sublane-padded outs
    tb = (_VMEM_TILE_BUDGET // per_lane) // 128 * 128
    tb = max(tb, 128)
    if b > 256:
        # Keep at least 2 grid steps so the "parallel" batch axis has work
        # for both v7x TensorCores (no effect on v5e/v6e).
        tb = min(tb, _round_up(_cdiv(b, 2), 128))
    else:
        tb = min(tb, _round_up(max(b, 1), 128))
    return tb


def _mlp_head_infer(u_t, v_t, w1u, w1v, b1_col, w2_col, tb):
    k, b = u_t.shape
    grid = (_cdiv(b, tb),)
    act_spec = pl.BlockSpec((k, tb), lambda i: (0, i))
    w_kk = pl.BlockSpec((k, k), lambda i: (0, 0))      # resident weights
    w_k1 = pl.BlockSpec((k, 1), lambda i: (0, 0))
    return pl.pallas_call(
        _ncf_infer_kernel,
        out_shape=jax.ShapeDtypeStruct((1, b), jnp.float32),
        grid_spec=pltpu.PrefetchScalarGridSpec(
            num_scalar_prefetch=0,
            grid=grid,
            in_specs=[act_spec, act_spec, w_kk, w_kk, w_k1, w_k1],
            out_specs=pl.BlockSpec((1, tb), lambda i: (0, i)),
        ),
        compiler_params=pltpu.CompilerParams(
            dimension_semantics=("parallel",),
            vmem_limit_bytes=_VMEM_LIMIT_BYTES),
    )(u_t, v_t, w1u, w1v, b1_col, w2_col)


def _mlp_head_train(u_t, v_t, ur_t, vr_t, w1u, w1v, b1_col, w2_col, tb):
    k, b = u_t.shape
    grid = (_cdiv(b, tb),)
    act_spec = pl.BlockSpec((k, tb), lambda i: (0, i))
    w_kk = pl.BlockSpec((k, k), lambda i: (0, 0))
    w_k1 = pl.BlockSpec((k, 1), lambda i: (0, 0))
    out_spec = pl.BlockSpec((1, tb), lambda i: (0, i))
    return pl.pallas_call(
        _ncf_train_kernel,
        out_shape=(jax.ShapeDtypeStruct((1, b), jnp.float32),) * 3,
        grid_spec=pltpu.PrefetchScalarGridSpec(
            num_scalar_prefetch=0,
            grid=grid,
            in_specs=[act_spec] * 4 + [w_kk, w_kk, w_k1, w_k1],
            out_specs=[out_spec] * 3,
        ),
        compiler_params=pltpu.CompilerParams(
            dimension_semantics=("parallel",),
            vmem_limit_bytes=_VMEM_LIMIT_BYTES),
    )(u_t, v_t, ur_t, vr_t, w1u, w1v, b1_col, w2_col)


def ncf_dib_forward(params, x, is_training=False):
    """Pallas implementation of NCF_DIB.forward."""
    W, H = params["W"], params["H"]
    W_r, H_r = params["W_r"], params["H_r"]
    w1, b1 = params["linear_1.weight"], params["linear_1.bias"]
    w2 = params["linear_2.weight"]

    user_idx = x[:, 0].astype(jnp.int32)
    item_idx = x[:, 1].astype(jnp.int32)
    B = x.shape[0]
    K = W.shape[1]

    # Gather straight into the (K, B) batch-on-lanes layout the kernel
    # consumes -- no separate transpose / concat / pad pass over the
    # activations in the wrapper.
    U_t = jnp.take(W.T.astype(jnp.float32), user_idx, axis=1)       # (K, B)
    V_t = jnp.take(H.T.astype(jnp.float32), item_idx, axis=1)       # (K, B)

    w1_f = w1.astype(jnp.float32)                                   # (K, 2K)
    w1u = w1_f[:, :K]                                               # (K, K)
    w1v = w1_f[:, K:]                                               # (K, K)
    b1_col = b1.astype(jnp.float32).reshape(K, 1)
    w2_col = w2.astype(jnp.float32).reshape(K, 1)

    if not is_training:
        tb = _pick_tile(B, K, n_act=2, n_out=1)
        out_row = _mlp_head_infer(U_t, V_t, w1u, w1v, b1_col, w2_col, tb)
        return out_row.reshape(B, 1)

    Ur_t = jnp.take(W_r.T.astype(jnp.float32), user_idx, axis=1)    # (K, B)
    Vr_t = jnp.take(H_r.T.astype(jnp.float32), item_idx, axis=1)    # (K, B)
    tb = _pick_tile(B, K, n_act=4, n_out=3)
    out_row, out_r_row, out_all_row = _mlp_head_train(
        U_t, V_t, Ur_t, Vr_t, w1u, w1v, b1_col, w2_col, tb)
    U_emb = U_t.T                                                    # (B, K)
    V_emb = V_t.T
    return (out_row.reshape(B, 1), out_r_row.reshape(B, 1),
            out_all_row.reshape(B, 1), U_emb, V_emb)


if __name__ == "__main__":
    num_users, num_items, K = 10, 12, 4

    key = jax.random.PRNGKey(0)
    kw, kh, kwr, khr, k1, kb, k2 = jax.random.split(key, 7)
    params = {
        "W": jax.random.normal(kw, (num_users, K), jnp.float32),
        "H": jax.random.normal(kh, (num_items, K), jnp.float32),
        "W_r": jax.random.normal(kwr, (num_users, K), jnp.float32),
        "H_r": jax.random.normal(khr, (num_items, K), jnp.float32),
        "linear_1.weight": 0.1 * jax.random.normal(k1, (K, 2 * K), jnp.float32),
        "linear_1.bias": 0.1 * jax.random.normal(kb, (K,), jnp.float32),
        "linear_2.weight": 0.1 * jax.random.normal(k2, (1, K), jnp.float32),
    }

    # Pure-JAX reference of the torch forward.
    def ref_head(U, V):
        z = jnp.concatenate([U, V], axis=1)
        h1 = jnp.maximum(z @ params["linear_1.weight"].T
                         + params["linear_1.bias"], 0.0)
        return h1 @ params["linear_2.weight"].T

    def check(B, seed):
        ku, ki = jax.random.split(jax.random.PRNGKey(seed))
        users = jax.random.randint(ku, (B,), 0, num_users, dtype=jnp.int32)
        items = jax.random.randint(ki, (B,), 0, num_items, dtype=jnp.int32)
        x = jnp.stack([users, items], axis=1)                 # (B, 2) int32

        U_ref, V_ref = params["W"][users], params["H"][items]
        Ur_ref, Vr_ref = params["W_r"][users], params["H_r"][items]
        ref_out = ref_head(U_ref, V_ref)
        ref_out_r = ref_head(Ur_ref, Vr_ref)
        ref_out_all = ref_head(U_ref + Ur_ref, V_ref + Vr_ref)

        # Inference path.
        out = ncf_dib_forward(params, x, is_training=False)
        out = jax.block_until_ready(out)
        assert out.shape == (B, 1)
        np.testing.assert_allclose(np.asarray(out), np.asarray(ref_out),
                                   rtol=1e-5, atol=1e-5)

        # Training path: (out, out_r, out_all, U_emb, V_emb) via one fused call.
        out_t, out_r, out_all, U_emb, V_emb = ncf_dib_forward(
            params, x, is_training=True)
        jax.block_until_ready((out_t, out_r, out_all, U_emb, V_emb))
        np.testing.assert_allclose(np.asarray(out_t), np.asarray(ref_out),
                                   rtol=1e-5, atol=1e-5)
        np.testing.assert_allclose(np.asarray(out_r), np.asarray(ref_out_r),
                                   rtol=1e-5, atol=1e-5)
        np.testing.assert_allclose(np.asarray(out_all), np.asarray(ref_out_all),
                                   rtol=1e-5, atol=1e-5)
        np.testing.assert_allclose(np.asarray(U_emb), np.asarray(U_ref),
                                   rtol=1e-5, atol=1e-5)
        np.testing.assert_allclose(np.asarray(V_emb), np.asarray(V_ref),
                                   rtol=1e-5, atol=1e-5)

    check(B=8, seed=1)       # tiny batch, single clipped tile
    check(B=300, seed=2)     # 2 grid steps + ragged (non-multiple-of-128) tail

    # TODO(synk): fit()/partial_fit()/predict*/BCELoss/Adam are host-side
    # training / utility code, not part of the forward pass, so they are not
    # translated to Pallas.
    print("KERNEL_OK")
</pallas_src>

<mosaic_0001>
module attributes {stable_mosaic.version = 11 : i64} {
  func.func @_ncf_infer_kernel(%arg0: i32, %arg1: memref<4x128xf32, #tpu.memory_space<vmem>>, %arg2: memref<4x128xf32, #tpu.memory_space<vmem>>, %arg3: memref<4x4xf32, #tpu.memory_space<vmem>>, %arg4: memref<4x4xf32, #tpu.memory_space<vmem>>, %arg5: memref<4x1xf32, #tpu.memory_space<vmem>>, %arg6: memref<4x1xf32, #tpu.memory_space<vmem>>, %arg7: memref<1x128xf32, #tpu.memory_space<vmem>>) attributes {dimension_semantics = [#tpu.dimension_semantics<parallel>], iteration_bounds = array<i64: 1>, scalar_prefetch = 0 : i64, scratch_operands = 0 : i64, tpu.core_type = #tpu.core_type<tc>, window_params = [{transform_indices = @transform_0, window_bounds = array<i64: 4, 128>}, {transform_indices = @transform_1, window_bounds = array<i64: 4, 128>}, {pipeline_mode = #tpu.pipeline_mode<synchronous>, transform_indices = @transform_2, window_bounds = array<i64: 4, 4>}, {pipeline_mode = #tpu.pipeline_mode<synchronous>, transform_indices = @transform_3, window_bounds = array<i64: 4, 4>}, {pipeline_mode = #tpu.pipeline_mode<synchronous>, transform_indices = @transform_4, window_bounds = array<i64: 4, 1>}, {pipeline_mode = #tpu.pipeline_mode<synchronous>, transform_indices = @transform_5, window_bounds = array<i64: 4, 1>}, {transform_indices = @transform_6, window_bounds = array<i64: 1, 128>}]} {
    %c0 = arith.constant 0 : index
    %c0_0 = arith.constant 0 : index
    %0 = vector.load %arg3[%c0, %c0_0] : memref<4x4xf32, #tpu.memory_space<vmem>>, vector<4x4xf32>
    %c0_1 = arith.constant 0 : index
    %c0_2 = arith.constant 0 : index
    %1 = vector.load %arg1[%c0_1, %c0_2] : memref<4x128xf32, #tpu.memory_space<vmem>>, vector<4x128xf32>
    %cst = arith.constant dense<0.000000e+00> : vector<4x128xf32>
    %2 = tpu.matmul %0, %1, %cst {dimension_numbers = #tpu.dot_dimension_numbers<[1], [0], [0], [1], [0, 0, 1, 1], [], []>} : vector<4x4xf32>, vector<4x128xf32>, vector<4x128xf32> -> vector<4x128xf32>
    %c0_3 = arith.constant 0 : index
    %c0_4 = arith.constant 0 : index
    %3 = vector.load %arg4[%c0_3, %c0_4] : memref<4x4xf32, #tpu.memory_space<vmem>>, vector<4x4xf32>
    %c0_5 = arith.constant 0 : index
    %c0_6 = arith.constant 0 : index
    %4 = vector.load %arg2[%c0_5, %c0_6] : memref<4x128xf32, #tpu.memory_space<vmem>>, vector<4x128xf32>
    %cst_7 = arith.constant dense<0.000000e+00> : vector<4x128xf32>
    %5 = tpu.matmul %3, %4, %cst_7 {dimension_numbers = #tpu.dot_dimension_numbers<[1], [0], [0], [1], [0, 0, 1, 1], [], []>} : vector<4x4xf32>, vector<4x128xf32>, vector<4x128xf32> -> vector<4x128xf32>
    %6 = arith.addf %2, %5 : vector<4x128xf32>
    %c0_8 = arith.constant 0 : index
    %c0_9 = arith.constant 0 : index
    %7 = vector.load %arg5[%c0_8, %c0_9] : memref<4x1xf32, #tpu.memory_space<vmem>>, vector<4x1xf32>
    %8 = vector.broadcast %7 : vector<4x1xf32> to vector<4x128xf32>
    %9 = arith.addf %6, %8 : vector<4x128xf32>
    %cst_10 = arith.constant 0.000000e+00 : f32
    %10 = vector.broadcast %cst_10 : f32 to vector<4x128xf32>
    %11 = arith.maximumf %9, %10 : vector<4x128xf32>
    %c0_11 = arith.constant 0 : index
    %c0_12 = arith.constant 0 : index
    %12 = vector.load %arg6[%c0_11, %c0_12] : memref<4x1xf32, #tpu.memory_space<vmem>>, vector<4x1xf32>
    %13 = vector.broadcast %12 : vector<4x1xf32> to vector<4x128xf32>
    %14 = arith.mulf %13, %11 : vector<4x128xf32>
    %cst_13 = arith.constant dense<0.000000e+00> : vector<128xf32>
    %15 = vector.multi_reduction <add>, %14, %cst_13 [0] : vector<4x128xf32> to vector<128xf32>
    %16 = vector.shape_cast %15 : vector<128xf32> to vector<1x128xf32>
    %c0_14 = arith.constant 0 : index
    %c0_15 = arith.constant 0 : index
    %17 = vector.load %arg7[%c0_14, %c0_15] : memref<1x128xf32, #tpu.memory_space<vmem>>, vector<1x128xf32>
    tpu.vector_store %arg7[%c0_14, %c0_15], %16 {strides = array<i32>} : memref<1x128xf32, #tpu.memory_space<vmem>>, vector<1x128xf32>,
    return
  }
  func.func @transform_0(%arg0: i32) -> (i32, i32) {
    %c0_i32 = arith.constant 0 : i32
    %c0_i32_0 = arith.constant 0 : i32
    return %c0_i32, %arg0 : i32, i32
  }
  func.func @transform_1(%arg0: i32) -> (i32, i32) {
    %c0_i32 = arith.constant 0 : i32
    %c0_i32_0 = arith.constant 0 : i32
    return %c0_i32, %arg0 : i32, i32
  }
  func.func @transform_2(%arg0: i32) -> (i32, i32) {
    %c0_i32 = arith.constant 0 : i32
    %c0_i32_0 = arith.constant 0 : i32
    %c0_i32_1 = arith.constant 0 : i32
    return %c0_i32, %c0_i32_0 : i32, i32
  }
  func.func @transform_3(%arg0: i32) -> (i32, i32) {
    %c0_i32 = arith.constant 0 : i32
    %c0_i32_0 = arith.constant 0 : i32
    %c0_i32_1 = arith.constant 0 : i32
    return %c0_i32, %c0_i32_0 : i32, i32
  }
  func.func @transform_4(%arg0: i32) -> (i32, i32) {
    %c0_i32 = arith.constant 0 : i32
    %c0_i32_0 = arith.constant 0 : i32
    %c0_i32_1 = arith.constant 0 : i32
    return %c0_i32, %c0_i32_0 : i32, i32
  }
  func.func @transform_5(%arg0: i32) -> (i32, i32) {
    %c0_i32 = arith.constant 0 : i32
    %c0_i32_0 = arith.constant 0 : i32
    %c0_i32_1 = arith.constant 0 : i32
    return %c0_i32, %c0_i32_0 : i32, i32
  }
  func.func @transform_6(%arg0: i32) -> (i32, i32) {
    %c0_i32 = arith.constant 0 : i32
    %c0_i32_0 = arith.constant 0 : i32
    return %c0_i32, %arg0 : i32, i32
  }
}

</mosaic_0001>

<bundles_post_ra>
// kernel: tpu_custom_call.1
= control target key start
LH: loop header
LB: loop body
LE: loop exit
PB: predicated region body
PF: predicated region fallthrough
CT: control target
= control target key end

     0   :  { %11 = vsyncpa [#allocation3], 0  ;;  %s301_s0 = inlined_call_operand.vmem [shape: f32[4,8], index: 0, kind: input, shape index: {}]   ;;  %s302_s1 = inlined_call_operand.vmem [shape: f32[4,8], index: 1, kind: input, shape index: {}]   ;;  %s303_s2 = inlined_call_operand.hbm [shape: f32[4,4], index: 2, kind: input, shape index: {}]   ;;  %s304_s3 = inlined_call_operand.hbm [shape: f32[4,4], index: 3, kind: input, shape index: {}]   ;;  %s305_s4 = inlined_call_operand.vmem [shape: f32[4,1], index: 4, kind: input, shape index: {}]   ;;  %s306_s5 = inlined_call_operand.vmem [shape: f32[4,1], index: 5, kind: input, shape index: {}]   ;;  %s307_s6 = inlined_call_operand.hbm [shape: f32[1,8], index: 6, kind: output, shape index: {}]  }
   0x1   :  { %12 = vsyncpa [#allocation6], 0 }
   0x2   :  { %13 = vsyncpa [#allocation4], 0  ;;  %s23_s23 = sshll.u32 %s303_s2, 4  ;;  %s238_s24 = smov [#allocation2]   ;;  %s24_s23 = int_to_ptr.hbm [resolvable:$true] %s23_s23 }
   0x3   :  { %s25_s25 = sshll.u32 %s238_s24, 4  ;;  %s34_s28 = sshll.u32 %s304_s3, 4  ;;  %s26_s25 = int_to_ptr.vmem [resolvable:$true] %s25_s25  ;;  %s35_s28 = int_to_ptr.hbm [resolvable:$true] %s34_s28 }
   0x4   :  { %28 = dma.hbm_to_vmem [thread:$0]  %s24_s23, 64, %s26_s25, [#allocation3]  }
   0x5   :  { %s239_s29 = smov [#allocation5]  }
   0x6   :  { %s36_s30 = sshll.u32 %s239_s29, 4  ;;  %s37_s30 = int_to_ptr.vmem [resolvable:$true] %s36_s30 }
   0x7   :  { %39 = dma.hbm_to_vmem [thread:$0]  %s35_s28, 64, %s37_s30, [#allocation6]  }
   0x8   :  { %232 = dma.done.wait [#allocation3], 64  }
   0x9   :  { %233 = vsyncadd [#allocation3], 4294967232 }
   0xa   :  { %234 = dma.done.wait [#allocation6], 64  }
   0xb   :  { %235 = vsyncadd [#allocation6], 4294967232  ;;  %v240_v0 = vmov 0   ;;  %vm60_vm0 = vcmask 1043456   ;;  %vm56_vm1 = vcmask 31744  }
   0xc   :  { %159 = vset.pattern.permute.xlu0 %v240_v0  ;;  %v55_v1 = vld [vmem:[%s302_s1] sm:$0xf]  ;;  %v54_v3 = vld [vmem:[#allocation5] sm:$0xf] }
   0xd   :  { %v53_v2 = vld [vmem:[%s301_s0] sm:$0xf]  ;;  %151 = vmatpush.msk.msra.mxu0 %vm60_vm0, %v55_v1  ;;  %s241_s0 = smov [#allocation7]  }
   0xe   :  { %153 = vmatpush.msk.msra.mxu1 %vm60_vm0, %v53_v2  ;;  %v52_v4 = vld [vmem:[#allocation2] sm:$0xf]  ;;  %152 = vmatmul.msk.f32.vlgmr.msra.gmra.mxu0 %vm56_vm1, %v54_v3  ;;  %s138_s1 = sshll.u32 %s241_s0, 4  ;;  %s139_s1 = int_to_ptr.vmem [resolvable:$true] %s138_s1 }
   0xf   :  { %v110_v5 = vld [vmem:[%s305_s4] sm:$0xf]  ;;  %154 = vmatmul.msk.f32.vlgmr.msra.gmra.mxu1 %vm56_vm1, %v52_v4 }
  0x10   :  { %113 = vperm.xlu0 %159, %v110_v5   ;;  %v118_v6 = vld [vmem:[%s306_s5] sm:$0xf]  ;;  %s140_s5 = sshll.u32 %s307_s6, 4  ;;  %s141_s5 = int_to_ptr.hbm [resolvable:$true] %s140_s5 }
  0x18   :  { %121 = vperm.xlu0 %159, %v118_v6  }
  0x82   :  { %v114_v7 = vpop.permute.xlu0 %113 }
  0x8a   :  { %v122_v13 = vpop.permute.xlu0 %121 }
  0x8b   :  { %v81_v8 = vpop.f32.mrf.mxu0 }
  0x8c   :  { %v107_v9 = vpop.f32.mrf.mxu1 }
  0x8d   :  { %v108_v10 = vadd.f32 %v107_v9, %v81_v8 }
  0x8f   :  { %v116_v11 = vadd.f32 %v114_v7, %v108_v10 }
  0x91   :  { %v117_v12 = vmax.f32 %v116_v11, 0.0 }
  0x93   :  { %v124_v14 = vmul.f32 %v122_v13, %v117_v12 }
  0x95   :  { %v125_v15 = vsel %vm60_vm0, %v124_v14, 0.0 }
  0x96   :  { %v126_v16 = vrot.slane %v125_v15, 4 }
  0x98   :  { %v127_v17 = vadd.f32 %v126_v16, %v125_v15 }
  0x9a   :  { %v128_v18 = vrot.slane %v127_v17, 2 }
  0x9c   :  { %v129_v19 = vadd.f32 %v128_v18, %v127_v17 }
  0x9e   :  { %v130_v20 = vrot.slane %v129_v19, 1 }
  0xa0   :  { %v131_v21 = vadd.f32 %v130_v20, %v129_v19 }
  0xa2   :  { %132 = vst [vmem:[#allocation7] sm:$0x1] %v131_v21 }
  0xa3   :  { %143 = dma.vmem_to_hbm [thread:$0]  %s139_s1, 16, %s141_s5, [#allocation4]  }
  0xa4   :  { %236 = dma.done.wait [#allocation4], 16  }
  0xa5   :  { %237 = vsyncadd [#allocation4], 4294967280 }
  0xa6   :  { %148 = vsyncpa [#allocation3], 1 }
  0xa7   :  { %149 = vsyncpa [#allocation6], 1 }
  0xa8   :  { %150 = vsyncpa [#allocation4], 1 }

</bundles_post_ra>
